<compile_context>
chip_gen: v7x
topology: tpu7x:2x2x1
jax: 0.10.0
libtpu: 0.0.40
codegen_flags: <defaults>
</compile_context>

<pallas_src>
import jax
import jax.numpy as jnp
import numpy as np
from jax import lax
from jax.experimental import pallas as pl
from jax.experimental.pallas import tpu as pltpu


def _round_up(x, m):
    return ((x + m - 1) // m) * m


def _pick_heads_per_group(num_heads, head_dim):
    """Smallest head group whose lane width is a multiple of 128 (else all heads)."""
    for g in range(1, num_heads):
        if num_heads % g == 0 and (g * head_dim) % 128 == 0:
            return g
    return num_heads


# ---------------- Kernel 1: fused QKV projection over all (padded) B*N rows --

def _qkv_proj_kernel(x_ref, w_ref, b_ref, q_ref, k_ref, v_ref):
    # x_ref: (TM, C) bf16, w_ref: (C, 3C) bf16 (attention scale folded into the
    # q columns), b_ref: (1, 3C) f32.  Outputs: three (TM, C) bf16 tiles.
    c = q_ref.shape[1]
    acc = jnp.dot(x_ref[...], w_ref[...], preferred_element_type=jnp.float32)
    acc = acc + b_ref[0]
    q_ref[...] = acc[:, :c].astype(q_ref.dtype)
    k_ref[...] = acc[:, c:2 * c].astype(k_ref.dtype)
    v_ref[...] = acc[:, 2 * c:].astype(v_ref.dtype)


# ---------------- Kernel 2: per-(batch, head-group) attention + output proj --

def _make_attn_kernel(heads_per_group, head_dim):
    def kernel(q_ref, k_ref, v_ref, pw_ref, pb_ref, out_ref, probs_ref,
               acc_ref):
        hg = pl.program_id(1)

        @pl.when(hg == 0)
        def _():
            acc_ref[...] = jnp.zeros_like(acc_ref)

        for h in range(heads_per_group):     # tiny static unroll (2 at prod sizes)
            lo = h * head_dim
            hi = lo + head_dim
            q = q_ref[0, :, lo:hi]           # (N, hd) bf16, already scaled
            k = k_ref[0, :, lo:hi]           # (N, hd) bf16
            v = v_ref[0, :, lo:hi]           # (N, hd) bf16

            # scores = q @ k^T, contracting dim 1 of both (no explicit transpose).
            s = lax.dot_general(q, k, (((1,), (1,)), ((), ())),
                                preferred_element_type=jnp.float32)   # (N, N) f32
            s_max = jnp.max(s, axis=-1, keepdims=True)
            e = jnp.exp(s - s_max)
            denom = jnp.sum(e, axis=-1, keepdims=True)
            inv = pl.reciprocal(denom, approx=True)      # EUP slot, keeps VALU free
            inv = inv * (2.0 - denom * inv)              # one Newton step on (N,1)
            p = e * inv                                  # (N, N) f32
            probs_ref[0, h] = p.astype(probs_ref.dtype)

            # ctx_h = p @ v; fold the (H, N, hd) -> (N, C) re-layout into the
            # output projection by contracting with proj_w rows [lo:hi, :].
            ctx = jnp.dot(p.astype(jnp.bfloat16), v,
                          preferred_element_type=jnp.float32)          # (N, hd)
            acc_ref[...] += jnp.dot(ctx.astype(jnp.bfloat16),
                                    pw_ref[lo:hi, :],
                                    preferred_element_type=jnp.float32)  # (N, C)

        @pl.when(hg == pl.num_programs(1) - 1)
        def _():
            out_ref[0] = (acc_ref[...] + pb_ref[0]).astype(out_ref.dtype)

    return kernel


# ---------------- Wrapper ----------------------------------------------------

def mgpstr_attention(hidden_states, qkv_w, qkv_b, proj_w, proj_b, *,
                     num_heads, probs_dtype=jnp.float32,
                     vmem_limit_bytes=32 * 1024 * 1024):
    """Pallas implementation of MgpstrAttention.forward.

    Args:
      hidden_states: (B, N, C)
      qkv_w: (C, 3C), qkv_b: (3C,)   (JAX convention: y = x @ W + b)
      proj_w: (C, C), proj_b: (C,)
      probs_dtype: dtype of the returned attention_probs (f32 matches the
        PyTorch module; bf16 halves the probs HBM writeback).
    Returns:
      (context_layer (B, N, C), attention_probs (B, H, N, N))
    """
    B, N, C = hidden_states.shape
    assert C % num_heads == 0, "hidden size must be divisible by num_heads"
    head_dim = C // num_heads
    scale = head_dim ** (-0.5)
    out_dtype = hidden_states.dtype

    # Fold the attention scale into the q columns; cast MXU operands to bf16.
    col_scale = jnp.concatenate(
        [jnp.full((C,), scale, dtype=jnp.float32),
         jnp.ones((2 * C,), dtype=jnp.float32)])
    qkv_w_bf = (qkv_w.astype(jnp.float32) * col_scale[None, :]).astype(jnp.bfloat16)
    qkv_b_f32 = (qkv_b.astype(jnp.float32) * col_scale).reshape(1, 3 * C)
    proj_w_bf = proj_w.astype(jnp.bfloat16)
    proj_b_f32 = proj_b.astype(jnp.float32).reshape(1, C)

    # ---- Kernel 1: (q, k, v) = split(x @ Wqkv + b) over all B*N rows ----
    rows = B * N
    tm = 256 if rows >= 256 else _round_up(rows, 8)
    rows_p = _round_up(rows, tm)
    x2d = hidden_states.reshape(rows, C).astype(jnp.bfloat16)
    if rows_p != rows:
        x2d = jnp.pad(x2d, ((0, rows_p - rows), (0, 0)))

    qkv_out_shape = jax.ShapeDtypeStruct((rows_p, C), jnp.bfloat16)
    q2d, k2d, v2d = pl.pallas_call(
        _qkv_proj_kernel,
        out_shape=(qkv_out_shape, qkv_out_shape, qkv_out_shape),
        grid_spec=pltpu.PrefetchScalarGridSpec(
            num_scalar_prefetch=0,
            grid=(rows_p // tm,),
            in_specs=[
                pl.BlockSpec((tm, C), lambda i: (i, 0)),        # x rows
                pl.BlockSpec((C, 3 * C), lambda i: (0, 0)),     # resident weight
                pl.BlockSpec((1, 3 * C), lambda i: (0, 0)),     # bias
            ],
            out_specs=[
                pl.BlockSpec((tm, C), lambda i: (i, 0)),
                pl.BlockSpec((tm, C), lambda i: (i, 0)),
                pl.BlockSpec((tm, C), lambda i: (i, 0)),
            ],
        ),
        compiler_params=pltpu.CompilerParams(
            dimension_semantics=("parallel",),
            vmem_limit_bytes=vmem_limit_bytes),
    )(x2d, qkv_w_bf, qkv_b_f32)

    q3 = q2d[:rows].reshape(B, N, C)   # row-major compatible reshapes (free)
    k3 = k2d[:rows].reshape(B, N, C)
    v3 = v2d[:rows].reshape(B, N, C)

    # ---- Kernel 2: per-(batch, head-group) attention + output projection ----
    g = _pick_heads_per_group(num_heads, head_dim)   # 2 at C=768/H=12; H if tiny
    num_groups = num_heads // g
    gw = g * head_dim                                 # lane width of one group

    kernel = _make_attn_kernel(g, head_dim)
    out, probs = pl.pallas_call(
        kernel,
        out_shape=(
            jax.ShapeDtypeStruct((B, N, C), out_dtype),
            jax.ShapeDtypeStruct((B, num_heads, N, N), probs_dtype),
        ),
        grid_spec=pltpu.PrefetchScalarGridSpec(
            num_scalar_prefetch=0,
            grid=(B, num_groups),
            in_specs=[
                pl.BlockSpec((1, N, gw), lambda b, hg: (b, 0, hg)),   # q group
                pl.BlockSpec((1, N, gw), lambda b, hg: (b, 0, hg)),   # k group
                pl.BlockSpec((1, N, gw), lambda b, hg: (b, 0, hg)),   # v group
                pl.BlockSpec((gw, C), lambda b, hg: (hg, 0)),         # proj_w rows
                pl.BlockSpec((1, C), lambda b, hg: (0, 0)),           # proj_b
            ],
            out_specs=[
                # Output block is resident across the head-group ("arbitrary") axis.
                pl.BlockSpec((1, N, C), lambda b, hg: (b, 0, 0)),
                pl.BlockSpec((1, g, N, N), lambda b, hg: (b, hg, 0, 0)),
            ],
            scratch_shapes=[pltpu.VMEM((N, C), jnp.float32)],         # acc
        ),
        compiler_params=pltpu.CompilerParams(
            dimension_semantics=("parallel", "arbitrary"),
            vmem_limit_bytes=vmem_limit_bytes),
    )(q3, k3, v3, proj_w_bf, proj_b_f32)

    # TODO(synk): make the probs output optional for callers that discard it;
    # its HBM writeback dominates kernel-2 bandwidth at production sizes.
    return out, probs


# ---------------- Pure-JAX reference -----------------------------------------

def _reference(hidden_states, qkv_w, qkv_b, proj_w, proj_b, *, num_heads):
    B, N, C = hidden_states.shape
    head_dim = C // num_heads
    scale = head_dim ** (-0.5)
    qkv = hidden_states @ qkv_w + qkv_b
    qkv = qkv.reshape(B, N, 3, num_heads, head_dim).transpose(2, 0, 3, 1, 4)
    q, k, v = qkv[0], qkv[1], qkv[2]
    scores = (q @ jnp.swapaxes(k, -2, -1)) * scale
    probs = jax.nn.softmax(scores, axis=-1)
    ctx = (probs @ v).transpose(0, 2, 1, 3).reshape(B, N, C)
    out = ctx @ proj_w + proj_b
    return out, probs


if __name__ == "__main__":
    # Small config consistent with the module: hidden_size=32, num_heads=4,
    # qkv_bias=True, attn_drop_rate=0.0, drop_rate=0.0.
    B, N, C = 2, 8, 32
    NUM_HEADS = 4

    key = jax.random.PRNGKey(0)
    k_x, k_qw, k_qb, k_pw, k_pb = jax.random.split(key, 5)

    hidden_states = jax.random.normal(k_x, (B, N, C), dtype=jnp.float32)
    qkv_w = 0.05 * jax.random.normal(k_qw, (C, 3 * C), dtype=jnp.float32)
    qkv_b = 0.05 * jax.random.normal(k_qb, (3 * C,), dtype=jnp.float32)
    proj_w = 0.05 * jax.random.normal(k_pw, (C, C), dtype=jnp.float32)
    proj_b = 0.05 * jax.random.normal(k_pb, (C,), dtype=jnp.float32)

    ctx_out, attn_probs = mgpstr_attention(
        hidden_states, qkv_w, qkv_b, proj_w, proj_b, num_heads=NUM_HEADS)
    jax.block_until_ready((ctx_out, attn_probs))

    ref_ctx, ref_probs = _reference(
        hidden_states, qkv_w, qkv_b, proj_w, proj_b, num_heads=NUM_HEADS)

    # Tolerance accounts for bf16 MXU operands (f32 accumulation) and the
    # EUP approximate-reciprocal (+1 Newton step) softmax denominator.
    np.testing.assert_allclose(np.asarray(ctx_out), np.asarray(ref_ctx),
                               rtol=2e-2, atol=2e-2)
    np.testing.assert_allclose(np.asarray(attn_probs), np.asarray(ref_probs),
                               rtol=2e-2, atol=2e-2)

    print("KERNEL_OK")
</pallas_src>

<mosaic_0001>
module attributes {stable_mosaic.version = 11 : i64} {
  func.func @_qkv_proj_kernel(%arg0: i32, %arg1: memref<16x32xbf16, #tpu.memory_space<vmem>>, %arg2: memref<32x96xbf16, #tpu.memory_space<vmem>>, %arg3: memref<1x96xf32, #tpu.memory_space<vmem>>, %arg4: memref<16x32xbf16, #tpu.memory_space<vmem>>, %arg5: memref<16x32xbf16, #tpu.memory_space<vmem>>, %arg6: memref<16x32xbf16, #tpu.memory_space<vmem>>) attributes {dimension_semantics = [#tpu.dimension_semantics<parallel>], iteration_bounds = array<i64: 1>, scalar_prefetch = 0 : i64, scratch_operands = 0 : i64, tpu.core_type = #tpu.core_type<tc>, window_params = [{transform_indices = @transform_0, window_bounds = array<i64: 16, 32>}, {pipeline_mode = #tpu.pipeline_mode<synchronous>, transform_indices = @transform_1, window_bounds = array<i64: 32, 96>}, {pipeline_mode = #tpu.pipeline_mode<synchronous>, transform_indices = @transform_2, window_bounds = array<i64: 1, 96>}, {transform_indices = @transform_3, window_bounds = array<i64: 16, 32>}, {transform_indices = @transform_4, window_bounds = array<i64: 16, 32>}, {transform_indices = @transform_5, window_bounds = array<i64: 16, 32>}]} {
    %c0 = arith.constant 0 : index
    %c0_0 = arith.constant 0 : index
    %0 = vector.load %arg1[%c0, %c0_0] : memref<16x32xbf16, #tpu.memory_space<vmem>>, vector<16x32xbf16>
    %c0_1 = arith.constant 0 : index
    %c0_2 = arith.constant 0 : index
    %1 = vector.load %arg2[%c0_1, %c0_2] : memref<32x96xbf16, #tpu.memory_space<vmem>>, vector<32x96xbf16>
    %cst = arith.constant dense<0.000000e+00> : vector<16x96xf32>
    %2 = tpu.matmul %0, %1, %cst {dimension_numbers = #tpu.dot_dimension_numbers<[1], [0], [0], [1], [0, 0, 1, 1], [], []>} : vector<16x32xbf16>, vector<32x96xbf16>, vector<16x96xf32> -> vector<16x96xf32>
    %c0_3 = arith.constant 0 : index
    %c0_4 = arith.constant 0 : index
    %3 = vector.load %arg3[%c0_3, %c0_4] : memref<1x96xf32, #tpu.memory_space<vmem>>, vector<1x96xf32>
    %4 = vector.shape_cast %3 : vector<1x96xf32> to vector<96xf32>
    %5 = vector.shape_cast %4 : vector<96xf32> to vector<1x96xf32>
    %6 = vector.broadcast %5 : vector<1x96xf32> to vector<16x96xf32>
    %7 = arith.addf %2, %6 : vector<16x96xf32>
    %8 = vector.extract_strided_slice %7 {offsets = [0, 0], sizes = [16, 32], strides = [1, 1]} : vector<16x96xf32> to vector<16x32xf32>
    %9 = arith.truncf %8 : vector<16x32xf32> to vector<16x32xbf16>
    %c0_5 = arith.constant 0 : index
    %c0_6 = arith.constant 0 : index
    %10 = vector.load %arg4[%c0_5, %c0_6] : memref<16x32xbf16, #tpu.memory_space<vmem>>, vector<16x32xbf16>
    tpu.vector_store %arg4[%c0_5, %c0_6], %9 {strides = array<i32>} : memref<16x32xbf16, #tpu.memory_space<vmem>>, vector<16x32xbf16>,
    %11 = vector.extract_strided_slice %7 {offsets = [0, 32], sizes = [16, 32], strides = [1, 1]} : vector<16x96xf32> to vector<16x32xf32>
    %12 = arith.truncf %11 : vector<16x32xf32> to vector<16x32xbf16>
    %c0_7 = arith.constant 0 : index
    %c0_8 = arith.constant 0 : index
    %13 = vector.load %arg5[%c0_7, %c0_8] : memref<16x32xbf16, #tpu.memory_space<vmem>>, vector<16x32xbf16>
    tpu.vector_store %arg5[%c0_7, %c0_8], %12 {strides = array<i32>} : memref<16x32xbf16, #tpu.memory_space<vmem>>, vector<16x32xbf16>,
    %14 = vector.extract_strided_slice %7 {offsets = [0, 64], sizes = [16, 32], strides = [1, 1]} : vector<16x96xf32> to vector<16x32xf32>
    %15 = arith.truncf %14 : vector<16x32xf32> to vector<16x32xbf16>
    %c0_9 = arith.constant 0 : index
    %c0_10 = arith.constant 0 : index
    %16 = vector.load %arg6[%c0_9, %c0_10] : memref<16x32xbf16, #tpu.memory_space<vmem>>, vector<16x32xbf16>
    tpu.vector_store %arg6[%c0_9, %c0_10], %15 {strides = array<i32>} : memref<16x32xbf16, #tpu.memory_space<vmem>>, vector<16x32xbf16>,
    return
  }
  func.func @transform_0(%arg0: i32) -> (i32, i32) {
    %c0_i32 = arith.constant 0 : i32
    %c0_i32_0 = arith.constant 0 : i32
    return %arg0, %c0_i32 : i32, i32
  }
  func.func @transform_1(%arg0: i32) -> (i32, i32) {
    %c0_i32 = arith.constant 0 : i32
    %c0_i32_0 = arith.constant 0 : i32
    %c0_i32_1 = arith.constant 0 : i32
    return %c0_i32, %c0_i32_0 : i32, i32
  }
  func.func @transform_2(%arg0: i32) -> (i32, i32) {
    %c0_i32 = arith.constant 0 : i32
    %c0_i32_0 = arith.constant 0 : i32
    %c0_i32_1 = arith.constant 0 : i32
    return %c0_i32, %c0_i32_0 : i32, i32
  }
  func.func @transform_3(%arg0: i32) -> (i32, i32) {
    %c0_i32 = arith.constant 0 : i32
    %c0_i32_0 = arith.constant 0 : i32
    return %arg0, %c0_i32 : i32, i32
  }
  func.func @transform_4(%arg0: i32) -> (i32, i32) {
    %c0_i32 = arith.constant 0 : i32
    %c0_i32_0 = arith.constant 0 : i32
    return %arg0, %c0_i32 : i32, i32
  }
  func.func @transform_5(%arg0: i32) -> (i32, i32) {
    %c0_i32 = arith.constant 0 : i32
    %c0_i32_0 = arith.constant 0 : i32
    return %arg0, %c0_i32 : i32, i32
  }
}

</mosaic_0001>

<bundles_post_ra>
// kernel: tpu_custom_call.1
= control target key start
LH: loop header
LB: loop body
LE: loop exit
PB: predicated region body
PF: predicated region fallthrough
CT: control target
= control target key end

     0   :  { %11 = vsyncpa [#allocation3], 0  ;;  %s483_s0 = inlined_call_operand.hbm [shape: bf16[16,32], index: 0, kind: input, shape index: {}]   ;;  %s484_s1 = inlined_call_operand.hbm [shape: bf16[32,96], index: 1, kind: input, shape index: {}]   ;;  %s485_s2 = inlined_call_operand.vmem [shape: f32[1,96], index: 2, kind: input, shape index: {}]   ;;  %s486_s3 = inlined_call_operand.hbm [shape: bf16[16,32], index: 3, kind: output, shape index: {0}]   ;;  %s487_s4 = inlined_call_operand.hbm [shape: bf16[16,32], index: 4, kind: output, shape index: {1}]   ;;  %s488_s5 = inlined_call_operand.hbm [shape: bf16[16,32], index: 5, kind: output, shape index: {2}]  }
   0x1   :  { %12 = vsyncpa [#allocation6], 0 }
   0x2   :  { %13 = vsyncpa [#allocation4], 0 }
   0x3   :  { %14 = vsyncpa [#allocation9], 0  ;;  %s350_s18 = smov [#allocation2]   ;;  %s232_s22 = scalar_lea.hbm %s483_s0, 128 }
   0x4   :  { %s20_s19 = sshll.u32 %s350_s18, 4  ;;  %p233_p0 = scmp.ne.s32.totalorder %s483_s0, %s232_s22  ;;  %s21_s19 = int_to_ptr.vmem [resolvable:$true] %s20_s19 }
   0x5   :  { %p236_p1 = scmp.lt.u32.totalorder %s232_s22, %s483_s0 }
   0x7   :  { %p238_p2 = pnand %p236_p1, %p233_p0 }
   0x9   :  { %241 = shalt.err (!%p238_p2)
}
   0xa   :  { %s242_s27 = scalar_lea.vmem %s21_s19, 128  ;;  %p247_p4 = scmp.lt.s32.totalorder %s21_s19, %s21_s19 }
   0xb   :  { %p243_p3 = scmp.ne.s32.totalorder %s21_s19, %s242_s27  ;;  %p248_p5 = scmp.lt.s32.totalorder %s242_s27, %s242_s27 }
   0xd   :  { %p249_p6 = por %p248_p5, %p247_p4 }
   0xf   :  { %p250_p7 = pnand %p249_p6, %p243_p3 }
  0x11   :  { %253 = shalt.err (!%p250_p7)
}
  0x12   :  { %s351_s28 = smov 64   ;;  %s352_s29 = smov 4  }
  0x13   :  { %26 = dma.hbm_to_vmem [thread:$0]  %s483_s0, 128, %s21_s19, [#allocation3], %s351_s28, %s351_s28, %s352_s29  }
  0x14   :  { %s353_s7 = smov [#allocation5]   ;;  %s254_s11 = scalar_lea.hbm %s484_s1, 256 }
  0x15   :  { %s32_s8 = sshll.u32 %s353_s7, 4  ;;  %p255_p8 = scmp.ne.s32.totalorder %s484_s1, %s254_s11  ;;  %s33_s8 = int_to_ptr.vmem [resolvable:$true] %s32_s8 }
  0x16   :  { %p258_p9 = scmp.lt.u32.totalorder %s254_s11, %s484_s1 }
  0x18   :  { %p260_p10 = pnand %p258_p9, %p255_p8 }
  0x1a   :  { %263 = shalt.err (!%p260_p10)
}
  0x1b   :  { %s264_s16 = scalar_lea.vmem %s33_s8, 256  ;;  %p269_p12 = scmp.lt.s32.totalorder %s33_s8, %s33_s8 }
  0x1c   :  { %p265_p11 = scmp.ne.s32.totalorder %s33_s8, %s264_s16  ;;  %p270_p13 = scmp.lt.s32.totalorder %s264_s16, %s264_s16 }
  0x1e   :  { %p271_p0 = por %p270_p13, %p269_p12 }
  0x20   :  { %p272_p1 = pnand %p271_p0, %p265_p11 }
  0x22   :  { %275 = shalt.err (!%p272_p1)
}
  0x23   :  { %38 = dma.hbm_to_vmem [thread:$0]  %s484_s1, 256, %s33_s8, [#allocation6], %s351_s28, %s351_s28, %s352_s29  }
  0x24   :  { %342 = dma.done.wait [#allocation3], 128  }
  0x25   :  { %343 = vsyncadd [#allocation3], 4294967168 }
  0x26   :  { %344 = dma.done.wait [#allocation6], 256  }
  0x27   :  { %345 = vsyncadd [#allocation6], 4294967040  ;;  %v354_v0 = vmov 0.0   ;;  %vm355_vm0 = vmmov 0   ;;  %v229_v1 = vld [vmem:[#allocation5] sm:$0xff]   ;;  %v230_v2 = vld [vmem:[#allocation5 + $0x8] sm:$0xff]  }
  0x28   :  { %211 = vmatprep.subr.bf16.mxu0 %v354_v0  ;;  %215 = vmatprep.mubr.msk.bf16.mxu0 %vm355_vm0, %v354_v0  ;;  %v231_v3 = vld [vmem:[#allocation2] sm:$0xff]   ;;  %vm78_vm1 = vcmask 261120   ;;  %vm131_vm2 = vcmask 257024   ;;  %s356_s1 = smov [#allocation7]   ;;  %s357_s21 = smov 96  }
  0x29   :  { %212 = vmatpush3.bf16.msra.mxu0 %v229_v1  ;;  %v199_v4 = vld [vmem:[%s485_s2] ss:$0 sm:$0xff]  ;;  %s155_s20 = sshll.u32 %s356_s1, 4  ;;  %s156_s20 = int_to_ptr.vmem [resolvable:$true] %s155_s20 }
  0x2a   :  { %213 = vmatprep.subr.bf16.mxu0 %v354_v0  ;;  %s276_s2 = scalar_lea.vmem %s156_s20, 128  ;;  %p281_p3 = scmp.lt.s32.totalorder %s156_s20, %s156_s20 }
  0x2b   :  { %p277_p2 = scmp.ne.s32.totalorder %s156_s20, %s276_s2  ;;  %p282_p4 = scmp.lt.s32.totalorder %s276_s2, %s276_s2 }
  0x2d   :  { %214 = vmatpush3.bf16.msra.mxu0 %v230_v2  ;;  %p283_p5 = por %p282_p4, %p281_p3 }
  0x2f   :  { %p284_p6 = pnand %p283_p5, %p277_p2 }
  0x30   :  { %216 = vmatmul.mubr.msk.bf16.vlgmr.msra.gmra.mrb[0].mxu0 %vm78_vm1, %v231_v3 }
 0x103   :  { %v116_v5 = vpop.f32.mrb[0].mxu0 }
 0x104   :  { %v117_v6 = vadd.f32 %v199_v4, %v116_v5  ;;  %v217_v7 = vpop.f32.mrb[1].mxu0 }
 0x105   :  { %v119_v8 = vpop.f32.mrb[2].mxu0 }
 0x106   :  { %v206_v9 = vpack.c.bf16 %v117_v6, %v117_v6  ;;  %v120_v10 = vadd.f32 %v199_v4, %v119_v8  ;;  %v218_v11 = vpop.f32.mrb[3].mxu0 }
 0x108   :  { %v207_v12 = vpack.c.bf16 %v120_v10, %v120_v10  ;;  %142 = vrot.lane.b32.xlu1 %v206_v9, %s351_s28  ;;  %134 = vrot.lane.b32.xlu0 %v206_v9, %s357_s21  ;;  %132 = vst.msk [vmem:[#allocation7] sm:$0xf] %vm131_vm2, %v206_v9 }
 0x10a   :  { %133 = vst.msk [vmem:[#allocation7 + $0x4] sm:$0xf] %vm131_vm2, %v207_v12 }
 0x10b   :  { %287 = shalt.err (!%p284_p6)
}
 0x10c   :  { %s288_s24 = scalar_lea.hbm %s486_s3, 128 }
 0x10d   :  { %p289_p7 = scmp.ne.s32.totalorder %s486_s3, %s288_s24  ;;  %p292_p8 = scmp.lt.u32.totalorder %s288_s24, %s486_s3 }
 0x10f   :  { %p294_p9 = pnand %p292_p8, %p289_p7 }
 0x111   :  { %297 = shalt.err (!%p294_p9)
}
 0x112   :  { %161 = dma.vmem_to_hbm [thread:$0]  %s156_s20, 128, %s486_s3, [#allocation4], %s351_s28, %s351_s28, %s352_s29  }
 0x113   :  { %144 = vrot.lane.b32.xlu1 %v207_v12, %s351_s28  ;;  %136 = vrot.lane.b32.xlu0 %v207_v12, %s357_s21  ;;  %s358_s8 = smov [#allocation8]   ;;  %s359_s10 = smov [#allocation10]  }
 0x114   :  { %s167_s9 = sshll.u32 %s358_s8, 4  ;;  %s179_s11 = sshll.u32 %s359_s10, 4  ;;  %s168_s9 = int_to_ptr.vmem [resolvable:$true] %s167_s9  ;;  %s444_s11 = int_to_ptr.vmem [resolvable:$true] %s179_s11 }
 0x115   :  { %s298_s3 = scalar_lea.vmem %s168_s9, 128  ;;  %p303_p11 = scmp.lt.s32.totalorder %s168_s9, %s168_s9 }
 0x116   :  { %p299_p10 = scmp.ne.s32.totalorder %s168_s9, %s298_s3  ;;  %p304_p12 = scmp.lt.s32.totalorder %s298_s3, %s298_s3 }
 0x118   :  { %p305_p13 = por %p304_p12, %p303_p11 }
 0x11a   :  { %p306_p0 = pnand %p305_p13, %p299_p10 }
 0x17a   :  { %v143_v13 = vpop.permute.xlu1 %142  ;;  %v135_v14 = vpop.permute.xlu0 %134 }
 0x17b   :  { %148 = vst.msk [vmem:[#allocation10] sm:$0xf] %vm131_vm2, %v143_v13  ;;  %140 = vst.msk [vmem:[#allocation8] sm:$0xf] %vm131_vm2, %v135_v14 }
 0x185   :  { %v145_v15 = vpop.permute.xlu1 %144  ;;  %v137_v16 = vpop.permute.xlu0 %136 }
 0x186   :  { %149 = vst.msk [vmem:[#allocation10 + $0x4] sm:$0xf] %vm131_vm2, %v145_v15  ;;  %141 = vst.msk [vmem:[#allocation8 + $0x4] sm:$0xf] %vm131_vm2, %v137_v16 }
 0x187   :  { %309 = shalt.err (!%p306_p0)
}
 0x188   :  { %s310_s14 = scalar_lea.hbm %s487_s4, 128 }
 0x189   :  { %p311_p1 = scmp.ne.s32.totalorder %s487_s4, %s310_s14  ;;  %p314_p2 = scmp.lt.u32.totalorder %s310_s14, %s487_s4 }
 0x18b   :  { %p316_p3 = pnand %p314_p2, %p311_p1 }
 0x18d   :  { %319 = shalt.err (!%p316_p3)
}
 0x18e   :  { %173 = dma.vmem_to_hbm [thread:$0]  %s168_s9, 128, %s487_s4, [#allocation9], %s351_s28, %s351_s28, %s352_s29  }
 0x18f   :  { %s320_s1 = scalar_lea.vmem %s444_s11, 128  ;;  %p325_p5 = scmp.lt.s32.totalorder %s444_s11, %s444_s11 }
 0x190   :  { %p321_p4 = scmp.ne.s32.totalorder %s444_s11, %s320_s1  ;;  %p326_p6 = scmp.lt.s32.totalorder %s320_s1, %s320_s1 }
 0x192   :  { %p327_p7 = por %p326_p6, %p325_p5 }
 0x194   :  { %p328_p8 = pnand %p327_p7, %p321_p4 }
 0x196   :  { %331 = shalt.err (!%p328_p8)
}
 0x197   :  { %s332_s2 = scalar_lea.hbm %s488_s5, 128 }
 0x198   :  { %p333_p9 = scmp.ne.s32.totalorder %s488_s5, %s332_s2  ;;  %p336_p10 = scmp.lt.u32.totalorder %s332_s2, %s488_s5 }
 0x19a   :  { %p338_p11 = pnand %p336_p10, %p333_p9 }
 0x19c   :  { %341 = shalt.err (!%p338_p11)
}
 0x19d   :  { %185 = dma.vmem_to_hbm [thread:$0]  %s444_s11, 128, %s488_s5, [#allocation9], %s351_s28, %s351_s28, %s352_s29  }
 0x19e   :  { %346 = dma.done.wait [#allocation4], 128  }
 0x19f   :  { %347 = vsyncadd [#allocation4], 4294967168 }
 0x1a0   :  { %348 = dma.done.wait [#allocation9], 256  }
 0x1a1   :  { %349 = vsyncadd [#allocation9], 4294967040 }
 0x1a2   :  { %195 = vsyncpa [#allocation3], 1 }
 0x1a3   :  { %196 = vsyncpa [#allocation6], 1 }
 0x1a4   :  { %197 = vsyncpa [#allocation4], 1 }
 0x1a5   :  { %198 = vsyncpa [#allocation9], 1 }

</bundles_post_ra>
